<compile_context>
chip_gen: v7x
topology: tpu7x:2x2x1
jax: 0.10.0
libtpu: 0.0.40
codegen_flags: <defaults>
</compile_context>

<pallas_src>
import functools

import jax
import jax.numpy as jnp
from jax.experimental import pallas as pl
from jax.experimental.pallas import tpu as pltpu

CONTEXT_LEN = 5              # context = [-2, -1, 0, 1, 2] (forward() indexes xc[0..4])
IN_F = 13
OUT1 = 12                    # linear1..linear4 (shared weights)
OUT5 = 16                    # linear5
OUT_F = 4 * OUT1 + OUT5      # 64
K_SPL = CONTEXT_LEN * IN_F   # 65: contraction size of the merged (spliced) matmul
EPS = 1e-5


def _round_up(n, m):
    return ((n + m - 1) // m) * m


def _cdiv(a, b):
    return -(-a // b)


def _splice_matmul_relu(x_ref, w_ref, b_ref, t0, tn, merged):
    """ReLU(splice(x) @ W + bias) for tn output frames starting at resident-block row t0.

    merged=True : lane-concatenate the 5 time-shifted (tn, 13) slices into one (tn, 65) LHS and
                  hit the MXU once with the block-diagonal (65, 64) weight.
    merged=False: fallback (5 small dots against the (13, 64) row-slabs of the same weight) for
                  backends where the lane-dim concatenate does not lower.
    Operands are cast to w_ref.dtype (bf16 by default -> single-pass MXU); accumulation is f32.
    """
    cols = [x_ref[pl.ds(t0 + i, tn), :] for i in range(CONTEXT_LEN)]
    if merged:
        xs = jnp.concatenate(cols, axis=-1).astype(w_ref.dtype)              # (tn, 65)
        acc = jnp.dot(xs, w_ref[...], preferred_element_type=jnp.float32)    # one MXU dot
    else:
        acc = None
        for i, col in enumerate(cols):
            d = jnp.dot(col.astype(w_ref.dtype), w_ref[i * IN_F:(i + 1) * IN_F, :],
                        preferred_element_type=jnp.float32)
            acc = d if acc is None else acc + d
    return jnp.maximum(acc + b_ref[...], 0.0)


def _stats_kernel(x_ref, w_ref, b_ref, sum_ref, sq_ref, *, tn, nt, tp_c, merged):
    """Pass 1: per-batch-element per-channel sum / sum-of-squares of ReLU(linear(splice(x)))."""
    j = pl.program_id(1)

    @pl.when(j == 0)
    def _():
        sum_ref[...] = jnp.zeros_like(sum_ref)
        sq_ref[...] = jnp.zeros_like(sq_ref)

    t0 = j * tn
    if tn % 8 == 0:
        t0 = pl.multiple_of(t0, 8)
    h = _splice_matmul_relu(x_ref, w_ref, b_ref, t0, tn, merged)             # (tn, 64)

    rem = tp_c - (nt - 1) * tn        # valid rows in the last time tile (static Python int)
    if rem == tn:
        # Exact tiling: no padded rows anywhere, accumulate unmasked.
        sum_ref[...] += jnp.sum(h, axis=0, keepdims=True)
        sq_ref[...] += jnp.sum(h * h, axis=0, keepdims=True)
    else:
        # Only the last tile contains zero-padded rows -> mask only there (statically gated).
        @pl.when(j < nt - 1)
        def _():
            sum_ref[...] += jnp.sum(h, axis=0, keepdims=True)
            sq_ref[...] += jnp.sum(h * h, axis=0, keepdims=True)

        @pl.when(j == nt - 1)
        def _():
            rows = jax.lax.broadcasted_iota(jnp.int32, (tn, OUT_F), 0)
            hm = jnp.where(rows < rem, h, 0.0)
            sum_ref[...] += jnp.sum(hm, axis=0, keepdims=True)
            sq_ref[...] += jnp.sum(hm * hm, axis=0, keepdims=True)


def _apply_kernel(x_ref, w_ref, b_ref, scale_ref, shift_ref, o_ref, *, tn, merged):
    """Pass 2: recompute ReLU(linear(splice(x))) and apply the folded BN affine."""
    j = pl.program_id(1)
    t0 = j * tn
    if tn % 8 == 0:
        t0 = pl.multiple_of(t0, 8)
    h = _splice_matmul_relu(x_ref, w_ref, b_ref, t0, tn, merged)
    # TODO(synk): lane-dense (N,64)->(N/2,128) output packing deferred; revisit with a bundle dump
    #             only if vst becomes critical after the merged-matmul change (v5e: 1 vst slot).
    o_ref[...] = h * scale_ref[...] + shift_ref[...]


def _vmem_limit_bytes(t_pad, tn):
    row = 128 * 4                       # any (rows, <=128) f32 block is lane-padded to 512 B/row
    need = 2 * t_pad * row              # resident x block, double-buffered
    need += 2 * tn * row                # (tn, 64) f32 output block, double-buffered
    need += 2 * tn * row                # in-kernel temporaries (spliced LHS, h)
    need += 8 << 20                     # weights/bias/stats blocks + compiler scratch margin
    return max(min(need, 48 << 20), 16 << 20)   # stay safely under v7x's 64 MiB physical VMEM


@functools.lru_cache(maxsize=None)
def _merged_splice_supported():
    """One-time probe: does the lane-dim concatenate used by the merged splice lower (and compute
    correctly) on this backend?  Falls back to the 5-dot path otherwise."""
    def probe(x_ref, w_ref, b_ref, o_ref):
        o_ref[...] = _splice_matmul_relu(x_ref, w_ref, b_ref, 0, 8, True)

    try:
        rows = 8 + CONTEXT_LEN - 1
        x = (((jnp.arange(rows * IN_F, dtype=jnp.float32) % 7) - 3.0) / 3.0).reshape(rows, IN_F)
        w = ((((jnp.arange(K_SPL * OUT_F, dtype=jnp.float32) % 5) - 2.0) / 4.0)
             .reshape(K_SPL, OUT_F).astype(jnp.bfloat16))
        b = jnp.full((1, OUT_F), 0.25, jnp.float32)
        out = pl.pallas_call(
            probe, out_shape=jax.ShapeDtypeStruct((8, OUT_F), jnp.float32))(x, w, b)
        xs = jnp.concatenate([x[i:i + 8, :] for i in range(CONTEXT_LEN)], axis=1).astype(w.dtype)
        ref = jnp.maximum(jnp.dot(xs, w, preferred_element_type=jnp.float32) + b, 0.0)
        return bool(jnp.allclose(out, ref, atol=1e-3, rtol=1e-3))
    except Exception:
        return False


def _chunk_specs(t_pad):
    x_spec = pl.BlockSpec((None, t_pad, IN_F), lambda b, j: (b, 0, 0))
    w_spec = pl.BlockSpec((K_SPL, OUT_F), lambda b, j: (0, 0))
    vec_spec = pl.BlockSpec((1, OUT_F), lambda b, j: (0, 0))
    return x_spec, w_spec, vec_spec


def _stats_pass(xc, w, bias, *, B, tp_c, tn, nt, t_pad, merged):
    x_spec, w_spec, vec_spec = _chunk_specs(t_pad)
    stat_spec = pl.BlockSpec((None, 1, OUT_F), lambda b, j: (b, 0, 0))
    return pl.pallas_call(
        functools.partial(_stats_kernel, tn=tn, nt=nt, tp_c=tp_c, merged=merged),
        grid=(B, nt),
        in_specs=[x_spec, w_spec, vec_spec],
        out_specs=[stat_spec, stat_spec],
        out_shape=[jax.ShapeDtypeStruct((B, 1, OUT_F), jnp.float32),
                   jax.ShapeDtypeStruct((B, 1, OUT_F), jnp.float32)],
        compiler_params=pltpu.CompilerParams(
            dimension_semantics=("parallel", "arbitrary"),   # batch shardable across TCs (v7x)
            vmem_limit_bytes=_vmem_limit_bytes(t_pad, tn)),
    )(xc, w, bias)


def _apply_pass(xc, w, bias, scale, shift, *, B, tp_c, tn, nt, t_pad, merged):
    x_spec, w_spec, vec_spec = _chunk_specs(t_pad)
    out_spec = pl.BlockSpec((None, tn, OUT_F), lambda b, j: (b, j, 0))
    return pl.pallas_call(
        functools.partial(_apply_kernel, tn=tn, merged=merged),
        grid=(B, nt),
        in_specs=[x_spec, w_spec, vec_spec, vec_spec, vec_spec],
        out_specs=out_spec,
        out_shape=jax.ShapeDtypeStruct((B, tp_c, OUT_F), jnp.float32),   # unpadded: no wrapper slice
        compiler_params=pltpu.CompilerParams(
            dimension_semantics=("parallel", "parallel"),
            vmem_limit_bytes=_vmem_limit_bytes(t_pad, tn)),
    )(xc, w, bias, scale, shift)


def tdnn_layer1(x, w1, b1, w5, b5, gamma, beta, *,
                max_tile_rows=8192, max_chunk_rows=16384, mxu_dtype=jnp.bfloat16):
    """x: (B, T, 13) float32.  Returns (B, T-4, 64): TdnnLayer1.forward with context
    [-2,-1,0,1,2] and train-mode BatchNorm (biased batch variance, eps=1e-5).

    mxu_dtype: operand dtype of the MXU matmul (accumulation is always f32).  bf16 (default)
    gives single-pass MXU matmuls; pass jnp.float32 to reproduce full-f32 operand numerics.
    """
    B, T, F = x.shape
    assert F == IN_F and T > CONTEXT_LEN - 1
    Tp = T - (CONTEXT_LEN - 1)

    max_tile_rows = max(8, _round_up(max_tile_rows, 8))
    max_chunk_rows = max(max_tile_rows, _round_up(max_chunk_rows, max_tile_rows))
    merged = _merged_splice_supported()

    # Single block-diagonal (65, 64) weight for the merged spliced matmul (row-slab i is the
    # zero-padded weight of context offset i, so the same array serves the fallback path).
    w_spl = jnp.zeros((K_SPL, OUT_F), jnp.float32)
    for i in range(4):
        w_spl = w_spl.at[i * IN_F:(i + 1) * IN_F, i * OUT1:(i + 1) * OUT1].set(w1.T)
    w_spl = w_spl.at[4 * IN_F:, 4 * OUT1:].set(w5.T)
    w_spl = w_spl.astype(mxu_dtype)
    bias = jnp.concatenate([b1, b1, b1, b1, b5]).reshape(1, OUT_F).astype(jnp.float32)

    # Chunk the output frames so the per-call resident (t_pad, 13) x block (512 B/row lane-padded,
    # double-buffered) stays within the v7x VMEM budget while keeping large time tiles.
    # TODO(synk): a manual halo DMA (memory_space=pl.ANY) or pipeline_mode=pl.Buffered(1) on x
    #             would remove chunking entirely; deferred since chunking already meets the budget.
    chunks = []
    for s in range(0, Tp, max_chunk_rows):
        tp_c = min(max_chunk_rows, Tp - s)
        if tp_c <= max_tile_rows:
            tn, nt = tp_c, 1                       # single tile == full extent: no padding at all
        else:
            tn, nt = max_tile_rows, _cdiv(tp_c, max_tile_rows)
        t_pad = nt * tn + (CONTEXT_LEN - 1)
        xc = x if (s == 0 and tp_c == Tp) else x[:, s:s + tp_c + CONTEXT_LEN - 1, :]
        if xc.shape[1] != t_pad:                   # zero-pad time only when the tiling is ragged
            xc = jnp.pad(xc, ((0, 0), (0, t_pad - xc.shape[1]), (0, 0)))
        chunks.append((xc, tp_c, tn, nt, t_pad))

    # ---- Pass 1: exact full-batch BN statistics (per-batch partials, reduced in JAX) ----
    total_sum = jnp.zeros((OUT_F,), jnp.float32)
    total_sq = jnp.zeros((OUT_F,), jnp.float32)
    for xc, tp_c, tn, nt, t_pad in chunks:
        psum, psq = _stats_pass(xc, w_spl, bias, B=B, tp_c=tp_c, tn=tn, nt=nt,
                                t_pad=t_pad, merged=merged)
        total_sum = total_sum + jnp.sum(psum, axis=(0, 1))
        total_sq = total_sq + jnp.sum(psq, axis=(0, 1))

    # ---- Tiny finalize in JAX: fold BN into one per-channel scale/shift ----
    # NOTE: var = E[h^2] - mean^2 in f32 can drift for very large B*Tp (it is clamped at 0);
    #       switch to mean-shifted accumulation if exact large-scale parity is ever required.
    n = jnp.float32(B * Tp)
    mean = total_sum / n
    var = jnp.maximum(total_sq / n - mean * mean, 0.0)      # biased variance (train-mode BN)
    inv = jax.lax.rsqrt(var + EPS)
    scale = (gamma * inv).reshape(1, OUT_F).astype(jnp.float32)
    shift = (beta - mean * gamma * inv).reshape(1, OUT_F).astype(jnp.float32)

    # ---- Pass 2: recompute matmul+ReLU per tile, apply folded affine, write (B, Tp, 64) ----
    outs = [_apply_pass(xc, w_spl, bias, scale, shift, B=B, tp_c=tp_c, tn=tn, nt=nt,
                        t_pad=t_pad, merged=merged)
            for xc, tp_c, tn, nt, t_pad in chunks]
    return outs[0] if len(outs) == 1 else jnp.concatenate(outs, axis=1)


def tdnn_layer1_ref(x, w1, b1, w5, b5, gamma, beta, matmul_dtype=jnp.float32):
    """Pure-JAX reference mirroring the PyTorch forward (matmul operands cast to matmul_dtype)."""
    Tp = x.shape[1] - (CONTEXT_LEN - 1)
    xs = [x[:, i:i + Tp, :].astype(matmul_dtype) for i in range(CONTEXT_LEN)]
    w1m = w1.T.astype(matmul_dtype)
    w5m = w5.T.astype(matmul_dtype)
    parts = [jnp.dot(xs[i], w1m, preferred_element_type=jnp.float32) + b1 for i in range(4)]
    parts.append(jnp.dot(xs[4], w5m, preferred_element_type=jnp.float32) + b5)
    h = jnp.maximum(jnp.concatenate(parts, axis=2), 0.0)
    mean = h.mean(axis=(0, 1))
    var = ((h - mean) ** 2).mean(axis=(0, 1))
    return gamma * (h - mean) / jnp.sqrt(var + EPS) + beta


if __name__ == "__main__":
    key = jax.random.PRNGKey(0)
    k_x, k_w1, k_b1, k_w5, k_b5, k_g, k_be = jax.random.split(key, 7)

    B, T = 2, 16                                   # small shapes; T-4 = 12 output frames
    x = jax.random.normal(k_x, (B, T, IN_F), jnp.float32)

    # Deterministic parameter init (synthetic weights, not a checkpoint load)
    w1 = jax.random.normal(k_w1, (OUT1, IN_F), jnp.float32) * 0.3     # linear1..4 shared
    b1 = jax.random.normal(k_b1, (OUT1,), jnp.float32) * 0.1
    w5 = jax.random.normal(k_w5, (OUT5, IN_F), jnp.float32) * 0.3     # linear5
    b5 = jax.random.normal(k_b5, (OUT5,), jnp.float32) * 0.1
    gamma = 1.0 + 0.1 * jax.random.normal(k_g, (OUT_F,), jnp.float32)   # BatchNorm weight
    beta = 0.1 * jax.random.normal(k_be, (OUT_F,), jnp.float32)         # BatchNorm bias

    out = jax.block_until_ready(tdnn_layer1(x, w1, b1, w5, b5, gamma, beta))
    assert out.shape == (B, T - 4, OUT_F)

    # The kernel runs the matmul with bf16 MXU operands (f32 accumulation) -- explicit policy per
    # the perf review.  Check tightly against a reference with the same operand rounding; call
    # tdnn_layer1(..., mxu_dtype=jnp.float32) if full-f32 operand numerics are required.
    ref = tdnn_layer1_ref(x, w1, b1, w5, b5, gamma, beta, matmul_dtype=jnp.bfloat16)
    assert jnp.allclose(out, ref, atol=2e-3, rtol=2e-3), "mismatch vs reference"

    print("KERNEL_OK")
</pallas_src>

<mosaic_0001>
module attributes {stable_mosaic.version = 11 : i64} {
  func.func @probe(%arg0: memref<12x13xf32, #tpu.memory_space<vmem>>, %arg1: memref<65x64xbf16, #tpu.memory_space<vmem>>, %arg2: memref<1x64xf32, #tpu.memory_space<vmem>>, %arg3: memref<8x64xf32, #tpu.memory_space<vmem>>) attributes {dimension_semantics = [], scalar_prefetch = 0 : i64, scratch_operands = 0 : i64, tpu.core_type = #tpu.core_type<tc>} {
    %c0 = arith.constant 0 : index
    %c0_0 = arith.constant 0 : index
    %0 = vector.load %arg0[%c0, %c0_0] : memref<12x13xf32, #tpu.memory_space<vmem>>, vector<8x13xf32>
    %c1 = arith.constant 1 : index
    %c0_1 = arith.constant 0 : index
    %1 = vector.load %arg0[%c1, %c0_1] : memref<12x13xf32, #tpu.memory_space<vmem>>, vector<8x13xf32>
    %c2 = arith.constant 2 : index
    %c0_2 = arith.constant 0 : index
    %2 = vector.load %arg0[%c2, %c0_2] : memref<12x13xf32, #tpu.memory_space<vmem>>, vector<8x13xf32>
    %c3 = arith.constant 3 : index
    %c0_3 = arith.constant 0 : index
    %3 = vector.load %arg0[%c3, %c0_3] : memref<12x13xf32, #tpu.memory_space<vmem>>, vector<8x13xf32>
    %c4 = arith.constant 4 : index
    %c0_4 = arith.constant 0 : index
    %4 = vector.load %arg0[%c4, %c0_4] : memref<12x13xf32, #tpu.memory_space<vmem>>, vector<8x13xf32>
    %5 = tpu.concatenate %0, %1, %2, %3, %4 in 1 : vector<8x13xf32>, vector<8x13xf32>, vector<8x13xf32>, vector<8x13xf32>, vector<8x13xf32> -> vector<8x65xf32>
    %6 = arith.truncf %5 : vector<8x65xf32> to vector<8x65xbf16>
    %c0_5 = arith.constant 0 : index
    %c0_6 = arith.constant 0 : index
    %7 = vector.load %arg1[%c0_5, %c0_6] : memref<65x64xbf16, #tpu.memory_space<vmem>>, vector<65x64xbf16>
    %cst = arith.constant dense<0.000000e+00> : vector<8x64xf32>
    %8 = tpu.matmul %6, %7, %cst {dimension_numbers = #tpu.dot_dimension_numbers<[1], [0], [0], [1], [0, 0, 1, 1], [], []>} : vector<8x65xbf16>, vector<65x64xbf16>, vector<8x64xf32> -> vector<8x64xf32>
    %c0_7 = arith.constant 0 : index
    %c0_8 = arith.constant 0 : index
    %9 = vector.load %arg2[%c0_7, %c0_8] : memref<1x64xf32, #tpu.memory_space<vmem>>, vector<1x64xf32>
    %10 = vector.broadcast %9 : vector<1x64xf32> to vector<8x64xf32>
    %11 = arith.addf %8, %10 : vector<8x64xf32>
    %cst_9 = arith.constant 0.000000e+00 : f32
    %12 = vector.broadcast %cst_9 : f32 to vector<8x64xf32>
    %13 = arith.maximumf %11, %12 : vector<8x64xf32>
    %c0_10 = arith.constant 0 : index
    %c0_11 = arith.constant 0 : index
    %14 = vector.load %arg3[%c0_10, %c0_11] : memref<8x64xf32, #tpu.memory_space<vmem>>, vector<8x64xf32>
    tpu.vector_store %arg3[%c0_10, %c0_11], %13 {strides = array<i32>} : memref<8x64xf32, #tpu.memory_space<vmem>>, vector<8x64xf32>,
    return
  }
}

module attributes {stable_mosaic.version = 11 : i64} {
  func.func @_stats_kernel(%arg0: i32, %arg1: i32, %arg2: memref<1x16x13xf32, #tpu.memory_space<vmem>>, %arg3: memref<65x64xbf16, #tpu.memory_space<vmem>>, %arg4: memref<1x64xf32, #tpu.memory_space<vmem>>, %arg5: memref<1x1x64xf32, #tpu.memory_space<vmem>>, %arg6: memref<1x1x64xf32, #tpu.memory_space<vmem>>) attributes {dimension_semantics = [#tpu.dimension_semantics<parallel>, #tpu.dimension_semantics<arbitrary>], iteration_bounds = array<i64: 2, 1>, scalar_prefetch = 0 : i64, scratch_operands = 0 : i64, tpu.core_type = #tpu.core_type<tc>, window_params = [{transform_indices = @transform_0, window_bounds = array<i64: 1, 16, 13>}, {pipeline_mode = #tpu.pipeline_mode<synchronous>, transform_indices = @transform_1, window_bounds = array<i64: 65, 64>}, {pipeline_mode = #tpu.pipeline_mode<synchronous>, transform_indices = @transform_2, window_bounds = array<i64: 1, 64>}, {transform_indices = @transform_3, window_bounds = array<i64: 1, 1, 64>}, {transform_indices = @transform_4, window_bounds = array<i64: 1, 1, 64>}]} {
    %c0_i32 = arith.constant 0 : i32
    %0 = arith.cmpi eq, %arg1, %c0_i32 : i32
    %1 = arith.extui %0 : i1 to i32
    %c0_i32_0 = arith.constant 0 : i32
    %2 = arith.cmpi ne, %1, %c0_i32_0 : i32
    scf.if %2 {
      %cst_38 = arith.constant 0.000000e+00 : f32
      %65 = vector.broadcast %cst_38 : f32 to vector<1x64xf32>
      %c0_39 = arith.constant 0 : index
      %c0_40 = arith.constant 0 : index
      %c0_41 = arith.constant 0 : index
      %66 = vector.load %arg5[%c0_39, %c0_40, %c0_41] : memref<1x1x64xf32, #tpu.memory_space<vmem>>, vector<1x1x64xf32>
      %67 = vector.shape_cast %66 : vector<1x1x64xf32> to vector<1x64xf32>
      %68 = vector.shape_cast %65 : vector<1x64xf32> to vector<1x1x64xf32>
      tpu.vector_store %arg5[%c0_39, %c0_40, %c0_41], %68 {strides = array<i32>} : memref<1x1x64xf32, #tpu.memory_space<vmem>>, vector<1x1x64xf32>,
      %cst_42 = arith.constant 0.000000e+00 : f32
      %69 = vector.broadcast %cst_42 : f32 to vector<1x64xf32>
      %c0_43 = arith.constant 0 : index
      %c0_44 = arith.constant 0 : index
      %c0_45 = arith.constant 0 : index
      %70 = vector.load %arg6[%c0_43, %c0_44, %c0_45] : memref<1x1x64xf32, #tpu.memory_space<vmem>>, vector<1x1x64xf32>
      %71 = vector.shape_cast %70 : vector<1x1x64xf32> to vector<1x64xf32>
      %72 = vector.shape_cast %69 : vector<1x64xf32> to vector<1x1x64xf32>
      tpu.vector_store %arg6[%c0_43, %c0_44, %c0_45], %72 {strides = array<i32>} : memref<1x1x64xf32, #tpu.memory_space<vmem>>, vector<1x1x64xf32>,
    } else {
    }
    %c12_i32 = arith.constant 12 : i32
    %3 = arith.muli %arg1, %c12_i32 : i32
    %c0_i32_1 = arith.constant 0 : i32
    %4 = arith.addi %3, %c0_i32_1 : i32
    %c0 = arith.constant 0 : index
    %5 = arith.index_cast %4 : i32 to index
    %c0_2 = arith.constant 0 : index
    %6 = vector.load %arg2[%c0, %5, %c0_2] : memref<1x16x13xf32, #tpu.memory_space<vmem>>, vector<1x12x13xf32>
    %7 = vector.shape_cast %6 : vector<1x12x13xf32> to vector<12x13xf32>
    %c1_i32 = arith.constant 1 : i32
    %8 = arith.addi %3, %c1_i32 : i32
    %c0_3 = arith.constant 0 : index
    %9 = arith.index_cast %8 : i32 to index
    %c0_4 = arith.constant 0 : index
    %10 = vector.load %arg2[%c0_3, %9, %c0_4] : memref<1x16x13xf32, #tpu.memory_space<vmem>>, vector<1x12x13xf32>
    %11 = vector.shape_cast %10 : vector<1x12x13xf32> to vector<12x13xf32>
    %c2_i32 = arith.constant 2 : i32
    %12 = arith.addi %3, %c2_i32 : i32
    %c0_5 = arith.constant 0 : index
    %13 = arith.index_cast %12 : i32 to index
    %c0_6 = arith.constant 0 : index
    %14 = vector.load %arg2[%c0_5, %13, %c0_6] : memref<1x16x13xf32, #tpu.memory_space<vmem>>, vector<1x12x13xf32>
    %15 = vector.shape_cast %14 : vector<1x12x13xf32> to vector<12x13xf32>
    %c3_i32 = arith.constant 3 : i32
    %16 = arith.addi %3, %c3_i32 : i32
    %c0_7 = arith.constant 0 : index
    %17 = arith.index_cast %16 : i32 to index
    %c0_8 = arith.constant 0 : index
    %18 = vector.load %arg2[%c0_7, %17, %c0_8] : memref<1x16x13xf32, #tpu.memory_space<vmem>>, vector<1x12x13xf32>
    %19 = vector.shape_cast %18 : vector<1x12x13xf32> to vector<12x13xf32>
    %c4_i32 = arith.constant 4 : i32
    %20 = arith.addi %3, %c4_i32 : i32
    %c0_9 = arith.constant 0 : index
    %21 = arith.index_cast %20 : i32 to index
    %c0_10 = arith.constant 0 : index
    %22 = vector.load %arg2[%c0_9, %21, %c0_10] : memref<1x16x13xf32, #tpu.memory_space<vmem>>, vector<1x12x13xf32>
    %23 = vector.shape_cast %22 : vector<1x12x13xf32> to vector<12x13xf32>
    %24 = arith.truncf %7 : vector<12x13xf32> to vector<12x13xbf16>
    %c0_11 = arith.constant 0 : index
    %c0_12 = arith.constant 0 : index
    %25 = vector.load %arg3[%c0_11, %c0_12] : memref<65x64xbf16, #tpu.memory_space<vmem>>, vector<13x64xbf16>
    %cst = arith.constant dense<0.000000e+00> : vector<12x64xf32>
    %26 = tpu.matmul %24, %25, %cst {dimension_numbers = #tpu.dot_dimension_numbers<[1], [0], [0], [1], [0, 0, 1, 1], [], []>} : vector<12x13xbf16>, vector<13x64xbf16>, vector<12x64xf32> -> vector<12x64xf32>
    %27 = arith.truncf %11 : vector<12x13xf32> to vector<12x13xbf16>
    %c13 = arith.constant 13 : index
    %c0_13 = arith.constant 0 : index
    %28 = vector.load %arg3[%c13, %c0_13] : memref<65x64xbf16, #tpu.memory_space<vmem>>, vector<13x64xbf16>
    %cst_14 = arith.constant dense<0.000000e+00> : vector<12x64xf32>
    %29 = tpu.matmul %27, %28, %cst_14 {dimension_numbers = #tpu.dot_dimension_numbers<[1], [0], [0], [1], [0, 0, 1, 1], [], []>} : vector<12x13xbf16>, vector<13x64xbf16>, vector<12x64xf32> -> vector<12x64xf32>
    %30 = arith.addf %26, %29 : vector<12x64xf32>
    %31 = arith.truncf %15 : vector<12x13xf32> to vector<12x13xbf16>
    %c26 = arith.constant 26 : index
    %c0_15 = arith.constant 0 : index
    %32 = vector.load %arg3[%c26, %c0_15] : memref<65x64xbf16, #tpu.memory_space<vmem>>, vector<13x64xbf16>
    %cst_16 = arith.constant dense<0.000000e+00> : vector<12x64xf32>
    %33 = tpu.matmul %31, %32, %cst_16 {dimension_numbers = #tpu.dot_dimension_numbers<[1], [0], [0], [1], [0, 0, 1, 1], [], []>} : vector<12x13xbf16>, vector<13x64xbf16>, vector<12x64xf32> -> vector<12x64xf32>
    %34 = arith.addf %30, %33 : vector<12x64xf32>
    %35 = arith.truncf %19 : vector<12x13xf32> to vector<12x13xbf16>
    %c39 = arith.constant 39 : index
    %c0_17 = arith.constant 0 : index
    %36 = vector.load %arg3[%c39, %c0_17] : memref<65x64xbf16, #tpu.memory_space<vmem>>, vector<13x64xbf16>
    %cst_18 = arith.constant dense<0.000000e+00> : vector<12x64xf32>
    %37 = tpu.matmul %35, %36, %cst_18 {dimension_numbers = #tpu.dot_dimension_numbers<[1], [0], [0], [1], [0, 0, 1, 1], [], []>} : vector<12x13xbf16>, vector<13x64xbf16>, vector<12x64xf32> -> vector<12x64xf32>
    %38 = arith.addf %34, %37 : vector<12x64xf32>
    %39 = arith.truncf %23 : vector<12x13xf32> to vector<12x13xbf16>
    %c52 = arith.constant 52 : index
    %c0_19 = arith.constant 0 : index
    %40 = vector.load %arg3[%c52, %c0_19] : memref<65x64xbf16, #tpu.memory_space<vmem>>, vector<13x64xbf16>
    %cst_20 = arith.constant dense<0.000000e+00> : vector<12x64xf32>
    %41 = tpu.matmul %39, %40, %cst_20 {dimension_numbers = #tpu.dot_dimension_numbers<[1], [0], [0], [1], [0, 0, 1, 1], [], []>} : vector<12x13xbf16>, vector<13x64xbf16>, vector<12x64xf32> -> vector<12x64xf32>
    %42 = arith.addf %38, %41 : vector<12x64xf32>
    %c0_21 = arith.constant 0 : index
    %c0_22 = arith.constant 0 : index
    %43 = vector.load %arg4[%c0_21, %c0_22] : memref<1x64xf32, #tpu.memory_space<vmem>>, vector<1x64xf32>
    %44 = vector.broadcast %43 : vector<1x64xf32> to vector<12x64xf32>
    %45 = arith.addf %42, %44 : vector<12x64xf32>
    %cst_23 = arith.constant 0.000000e+00 : f32
    %46 = vector.broadcast %cst_23 : f32 to vector<12x64xf32>
    %47 = arith.maximumf %45, %46 : vector<12x64xf32>
    %c0_24 = arith.constant 0 : index
    %c0_25 = arith.constant 0 : index
    %c0_26 = arith.constant 0 : index
    %48 = vector.load %arg5[%c0_24, %c0_25, %c0_26] : memref<1x1x64xf32, #tpu.memory_space<vmem>>, vector<1x1x64xf32>
    %49 = vector.shape_cast %48 : vector<1x1x64xf32> to vector<1x64xf32>
    %cst_27 = arith.constant dense<0.000000e+00> : vector<64xf32>
    %50 = vector.multi_reduction <add>, %47, %cst_27 [0] : vector<12x64xf32> to vector<64xf32>
    %51 = vector.shape_cast %50 : vector<64xf32> to vector<1x64xf32>
    %52 = arith.addf %49, %51 : vector<1x64xf32>
    %c0_28 = arith.constant 0 : index
    %c0_29 = arith.constant 0 : index
    %c0_30 = arith.constant 0 : index
    %53 = vector.load %arg5[%c0_28, %c0_29, %c0_30] : memref<1x1x64xf32, #tpu.memory_space<vmem>>, vector<1x1x64xf32>
    %54 = vector.shape_cast %53 : vector<1x1x64xf32> to vector<1x64xf32>
    %55 = vector.shape_cast %52 : vector<1x64xf32> to vector<1x1x64xf32>
    tpu.vector_store %arg5[%c0_28, %c0_29, %c0_30], %55 {strides = array<i32>} : memref<1x1x64xf32, #tpu.memory_space<vmem>>, vector<1x1x64xf32>,
    %c0_31 = arith.constant 0 : index
    %c0_32 = arith.constant 0 : index
    %c0_33 = arith.constant 0 : index
    %56 = vector.load %arg6[%c0_31, %c0_32, %c0_33] : memref<1x1x64xf32, #tpu.memory_space<vmem>>, vector<1x1x64xf32>
    %57 = vector.shape_cast %56 : vector<1x1x64xf32> to vector<1x64xf32>
    %58 = arith.mulf %47, %47 : vector<12x64xf32>
    %cst_34 = arith.constant dense<0.000000e+00> : vector<64xf32>
    %59 = vector.multi_reduction <add>, %58, %cst_34 [0] : vector<12x64xf32> to vector<64xf32>
    %60 = vector.shape_cast %59 : vector<64xf32> to vector<1x64xf32>
    %61 = arith.addf %57, %60 : vector<1x64xf32>
    %c0_35 = arith.constant 0 : index
    %c0_36 = arith.constant 0 : index
    %c0_37 = arith.constant 0 : index
    %62 = vector.load %arg6[%c0_35, %c0_36, %c0_37] : memref<1x1x64xf32, #tpu.memory_space<vmem>>, vector<1x1x64xf32>
    %63 = vector.shape_cast %62 : vector<1x1x64xf32> to vector<1x64xf32>
    %64 = vector.shape_cast %61 : vector<1x64xf32> to vector<1x1x64xf32>
    tpu.vector_store %arg6[%c0_35, %c0_36, %c0_37], %64 {strides = array<i32>} : memref<1x1x64xf32, #tpu.memory_space<vmem>>, vector<1x1x64xf32>,
    return
  }
  func.func @transform_0(%arg0: i32, %arg1: i32) -> (i32, i32, i32) {
    %c0_i32 = arith.constant 0 : i32
    %c0_i32_0 = arith.constant 0 : i32
    %c0_i32_1 = arith.constant 0 : i32
    return %arg0, %c0_i32, %c0_i32_0 : i32, i32, i32
  }
  func.func @transform_1(%arg0: i32, %arg1: i32) -> (i32, i32) {
    %c0_i32 = arith.constant 0 : i32
    %c0_i32_0 = arith.constant 0 : i32
    %c0_i32_1 = arith.constant 0 : i32
    return %c0_i32, %c0_i32_0 : i32, i32
  }
  func.func @transform_2(%arg0: i32, %arg1: i32) -> (i32, i32) {
    %c0_i32 = arith.constant 0 : i32
    %c0_i32_0 = arith.constant 0 : i32
    %c0_i32_1 = arith.constant 0 : i32
    return %c0_i32, %c0_i32_0 : i32, i32
  }
  func.func @transform_3(%arg0: i32, %arg1: i32) -> (i32, i32, i32) {
    %c0_i32 = arith.constant 0 : i32
    %c0_i32_0 = arith.constant 0 : i32
    %c0_i32_1 = arith.constant 0 : i32
    return %arg0, %c0_i32, %c0_i32_0 : i32, i32, i32
  }
  func.func @transform_4(%arg0: i32, %arg1: i32) -> (i32, i32, i32) {
    %c0_i32 = arith.constant 0 : i32
    %c0_i32_0 = arith.constant 0 : i32
    %c0_i32_1 = arith.constant 0 : i32
    return %arg0, %c0_i32, %c0_i32_0 : i32, i32, i32
  }
}

</mosaic_0001>

<bundles_post_ra>
// kernel: tpu_custom_call.1
= control target key start
LH: loop header
LB: loop body
LE: loop exit
PB: predicated region body
PF: predicated region fallthrough
CT: control target
= control target key end

     0   :  { %s220_s18 = smov 13   ;;  %s221_s19 = smov 39   ;;  %v222_v4 = vmov 0.0   ;;  %vm225_vm0 = vmmov 0   ;;  %s293_s0 = inlined_call_operand.vmem [shape: f32[12,13], index: 0, kind: input, shape index: {}]   ;;  %s294_s1 = inlined_call_operand.vmem [shape: bf16[65,64], index: 1, kind: input, shape index: {}]   ;;  %s295_s2 = inlined_call_operand.vmem [shape: f32[1,64], index: 2, kind: input, shape index: {}]   ;;  %s296_s3 = inlined_call_operand.hbm [shape: f32[8,64], index: 3, kind: output, shape index: {}]  }
   0x1   :  { %v17_v0 = vld [vmem:[%s293_s0 + $0x1] sm:$0xff]  ;;  %169 = vmatprep.subr.bf16.mxu0 %v222_v4  ;;  %s223_s26 = smov 26   ;;  %s224_s27 = smov 52   ;;  %179 = vmatprep.mubr.msk.bf16.mxu0 %vm225_vm0, %v222_v4 }
   0x2   :  { %v19_v1 = vld [vmem:[%s293_s0 + $0x3] sm:$0xff]  ;;  %22 = vrot.lane.b32.xlu0 %v17_v0, %s220_s18 }
   0x3   :  { %v18_v2 = vld [vmem:[%s293_s0 + $0x2] sm:$0xff]  ;;  %30 = vrot.lane.b32.xlu1 %v19_v1, %s221_s19 }
   0x4   :  { %v20_v3 = vld [vmem:[%s293_s0 + $0x4] sm:$0xff] }
   0x5   :  { %v191_v5 = vld [vmem:[%s294_s1] sm:$0xff]   ;;  %v192_v6 = vld [vmem:[%s294_s1 + $0x8] sm:$0xff]  }
   0x6   :  { %170 = vmatpush3.bf16.msra.mxu0 %v191_v5  ;;  %26 = vrot.lane.b32.xlu0 %v18_v2, %s223_s26 }
   0x7   :  { %34 = vrot.lane.b32.xlu1 %v20_v3, %s224_s27  ;;  %171 = vmatprep.subr.bf16.mxu0 %v222_v4 }
   0x8   :  { %8 = vsyncpa [#allocation3], 0  ;;  %v193_v7 = vld [vmem:[%s294_s1 + $0x10] sm:$0xff]   ;;  %vm93_vm1 = vcmask 1040384   ;;  %v194_v8 = vld [vmem:[%s294_s1 + $0x18] sm:$0xff]   ;;  %v226_v10 = vmov 0  }
   0x9   :  { %v195_v9 = vld [vmem:[%s294_s1 + $0x20] ss:$0 sps:$4 sm:$0x11]   ;;  %v95_v11 = vsel %vm93_vm1, 65535, %v226_v10  ;;  %vm37_vm2 = vcmask 105472   ;;  %vm39_vm3 = vcmask 211968  }
   0xa   :  { %172 = vmatpush3.bf16.msra.mxu0 %v192_v6  ;;  %v97_v12 = vand.u32 %v195_v9, %v95_v11  ;;  %v16_v15 = vld [vmem:[%s293_s0] sm:$0xff]  ;;  %vm41_vm4 = vcmask 318464   ;;  %vm43_vm5 = vcmask 424960   ;;  %vm89_vm6 = vcmask 531456   ;;  %s227_s10 = smov [#allocation2]  }
   0xb   :  { %173 = vmatprep.subr.bf16.mxu0 %v222_v4  ;;  %v156_v23 = vld [vmem:[%s295_s2] ss:$0 sm:$0xff]  ;;  %s148_s11 = sshll.u32 %s227_s10, 4  ;;  %vm140_vm7 = vcmask 523264   ;;  %s149_s11 = int_to_ptr.vmem [resolvable:$true] %s148_s11 }
   0xc   :  { %s196_s0 = scalar_lea.vmem %s149_s11, 128  ;;  %p201_p1 = scmp.lt.s32.totalorder %s149_s11, %s149_s11 }
   0xd   :  { %p197_p0 = scmp.ne.s32.totalorder %s149_s11, %s196_s0  ;;  %p202_p2 = scmp.lt.s32.totalorder %s196_s0, %s196_s0 }
   0xe   :  { %174 = vmatpush3.bf16.msra.mxu0 %v193_v7 }
   0xf   :  { %175 = vmatprep.subr.bf16.mxu0 %v222_v4  ;;  %p203_p3 = por %p202_p2, %p201_p1 }
  0x11   :  { %p204_p4 = pnand %p203_p3, %p197_p0 }
  0x12   :  { %176 = vmatpush3.bf16.msra.mxu0 %v194_v8 }
  0x13   :  { %177 = vmatprep.subr.bf16.mxu0 %v222_v4 }
  0x16   :  { %178 = vmatpush3.bf16.msra.mxu0 %v97_v12 }
  0x74   :  { %v23_v13 = vpop.permute.xlu0 %22 }
  0x75   :  { %v31_v14 = vpop.permute.xlu1 %30  ;;  %v38_v16 = vsel %vm37_vm2, %v16_v15, %v23_v13 }
  0x78   :  { %v27_v17 = vpop.permute.xlu0 %26 }
  0x79   :  { %v35_v18 = vpop.permute.xlu1 %34  ;;  %v40_v19 = vsel %vm39_vm3, %v38_v16, %v27_v17 }
  0x7a   :  { %v42_v20 = vsel %vm41_vm4, %v40_v19, %v31_v14 }
  0x7b   :  { %v44_v21 = vsel %vm43_vm5, %v42_v20, %v35_v18 }
  0x7c   :  { %v45_v22 = vpack.c.bf16 %v44_v21, %v44_v21 }
  0x7e   :  { %180 = vmatmul.mubr.msk.bf16.vlgmr.msra.gmra.mrb[0].mxu0 %vm89_vm6, %v45_v22 }
 0x151   :  { %v133_v24 = vpop.f32.mrb[0].mxu0 }
 0x152   :  { %v134_v25 = vadd.f32 %v156_v23, %v133_v24  ;;  %v181_v26 = vpop.f32.mrb[1].mxu0 }
 0x153   :  { %v136_v27 = vpop.f32.mrb[2].mxu0 }
 0x154   :  { %v139_v28 = vmax.f32 %v134_v25, 0.0  ;;  %v182_v29 = vpop.f32.mrb[3].mxu0 }
 0x156   :  { %141 = vst.msk [vmem:[#allocation2] sm:$0xff] %vm140_vm7, %v139_v28 }
 0x157   :  { %207 = shalt.err (!%p204_p4)
}
 0x158   :  { %s208_s13 = scalar_lea.hbm %s296_s3, 128 }
 0x159   :  { %p209_p5 = scmp.ne.s32.totalorder %s296_s3, %s208_s13  ;;  %p212_p6 = scmp.lt.u32.totalorder %s208_s13, %s296_s3 }
 0x15b   :  { %p214_p7 = pnand %p212_p6, %p209_p5 }
 0x15d   :  { %217 = shalt.err (!%p214_p7)
}
 0x15e   :  { %151 = dma.vmem_to_hbm [thread:$0]  %s149_s11, 128, %s296_s3, [#allocation3]  }
 0x15f   :  { %218 = dma.done.wait [#allocation3], 128  }
 0x160   :  { %219 = vsyncadd [#allocation3], 4294967168 }
 0x161   :  { %155 = vsyncpa [#allocation3], 1 }

// kernel: tpu_custom_call.1
= control target key start
LH: loop header
LB: loop body
LE: loop exit
PB: predicated region body
PF: predicated region fallthrough
CT: control target
= control target key end

     0   :  { %10 = vsyncpa [#allocation3], 0  ;;  %s1279_s0 = inlined_call_operand.vmem [shape: f32[2,16,13], index: 0, kind: input, shape index: {}]   ;;  %s1280_s1 = inlined_call_operand.vmem [shape: bf16[65,64], index: 1, kind: input, shape index: {}]   ;;  %s1281_s2 = inlined_call_operand.vmem [shape: f32[1,64], index: 2, kind: input, shape index: {}]   ;;  %s1282_s3 = inlined_call_operand.hbm [shape: f32[2,1,64], index: 3, kind: output, shape index: {0}]   ;;  %s1283_s4 = inlined_call_operand.hbm [shape: f32[2,1,64], index: 4, kind: output, shape index: {1}]  }
   0x1   :  { %12 = vsyncpa [#allocation3 + $0x1], 0 }
   0x2   :  { %13 = vsyncpa [#allocation5], 0 }
   0x3   :  { %15 = vsyncpa [#allocation5 + $0x1], 0  ;;  %s1046_s15 = smov 0   ;;  %s1048_s16 = smov 0  }
   0x4   :  { %s1050_s17 = smov 0   ;;  %s1052_s18 = smov 0  }
   0x5   :  { %s1054_s19 = smov 0   ;;  %s1056_s20 = smov 0  }
   0x6 LB: > { %s759_s21 = sadd.s32 4294967295, %s1014_s20   ;;  %s760_s22 = sadd.s32 4294967294, %s1014_s20   ;;  %s1014_s20 = sphi %s1056_s20, %s21_s20   ;;  %s1010_s19 = sphi %s1054_s19, %s1290_s19   ;;  %s1006_s18 = sphi %s1052_s18, %s1289_s18   ;;  %s1002_s17 = sphi %s1050_s17, %s1288_s17   ;;  %s998_s16 = sphi %s1048_s16, %s1287_s16   ;;  %s994_s15 = sphi %s1046_s15, %s1286_s15  }
   0x7   : > { %s33_s23 = sadd.s32 1, %s1010_s19  ;;  %s108_s24 = sadd.s32 1, %s1002_s17 }
   0x8   : > { %p35_p0 = scmp.ge.s32.totalorder %s33_s23, 2  ;;  %p118_p1 = scmp.ne.s32.totalorder %s1002_s17, %s998_s16 }
   0x9   : > { %p119_p2 = scmp.eq.s32.totalorder %s759_s21, 1  ;;  %p124_p3 = scmp.ne.s32.totalorder %s998_s16, %s994_s15 }
   0xa   : > { %s1292_s23 = smov (%p35_p0, %s33_s23), 0  ;;  %p125_p5 = scmp.eq.s32.totalorder %s760_s22, 1 }
   0xb   : > { %p1086_p4 = por %p119_p2, %p118_p1  ;;  %s105_s26 = ssub.s32 %s1010_s19, %s1292_s23 }
   0xc   : > { %p763_p6 = scmp.ge.s32.totalorder %s1014_s20, 1  ;;  %p106_p7 = scmp.eq.s32.totalorder %s105_s26, 0 }
   0xd   : > { %p1093_p8 = por %p125_p5, %p124_p3  ;;  %p183_p9 = scmp.lt.s32.totalorder %s1014_s20, 3 }
   0xe   : > { %s1099_s28 = scalar_select %p106_p7, %s1002_s17, %s108_s24  }
   0xf   : > { %p184_p10 = pnand %p763_p6, %p183_p9 }
  0x10   : > { %vm282_vm0 = vcmask (!%p184_p10), 1045504   ;;  %v1016_v0 = vmov (!%p184_p10), 0.0   ;;  %v896_v1 = vld [vmem:[%s1280_s1 + $0x4] sm:$0xfc] (!%p184_p10)   ;;  %vm260_vm1 = vsmask.f32 (!%p184_p10), 5376 }
  0x11   : > { %187 = sbr.rel (%p184_p10) target bundleno = 321 (0x141), region = 32  ;;  %803 = vmatprep.subr.bf16.mxu0 (!%p184_p10), %v1016_v0  ;;  %809 = vmatprep.subr.bf16.mxu1 (!%p184_p10), %v1016_v0  ;;  %v897_v2 = vld [vmem:[%s1280_s1 + $0xc] ss:$0 sps:$4 sm:$0x11] (!%p184_p10)   ;;  %vm283_vm2 = vcmask (!%p184_p10), 1046528   ;;  %v262_v3 = vshrl.u32 (!%p184_p10), %v896_v1, 16 }
  0x12   : > { %v265_v4 = vshll.u32 (!%p184_p10), %v896_v1, 16  ;;  %v1017_v5 = vmov (!%p184_p10), 65535   ;;  %vm1018_vm3 = vmmov (!%p184_p10), 0   ;;  %p212_p11 = scmp.lt.s32.totalorder (!%p184_p10), %s1006_s18, 1  ;;  %v270_v7 = vshrl.u32 (!%p184_p10), %v897_v2, 16  ;;  %s1173_s8 = sand.u32 (!%p184_p10), 1, %s998_s16  }
  0x13   : > { %v284_v6 = vsel (!%p184_p10), %vm282_vm0, 4294967295, %v1017_v5  ;;  %805 = vmatprep.mubr.msk.bf16.mxu0 (!%p184_p10), %vm1018_vm3, %v1016_v0  ;;  %811 = vmatprep.mubr.msk.bf16.mxu1 (!%p184_p10), %vm1018_vm3, %v1016_v0  ;;  %v273_v8 = vshll.u32 (!%p184_p10), %v897_v2, 16  ;;  %v264_v10 = vrot.slane (!%p184_p10), %v262_v3, 2  ;;  %v898_v12 = vld [vmem:[%s1280_s1] sm:$0x7f] (!%p184_p10)   ;;  %vm278_vm4 = vcmask (!%p184_p10), 105472  }
  0x14   : > { %v1115_v9 = vsel (!%p184_p10), %vm283_vm2, %v284_v6, 0  ;;  %v267_v11 = vrot.slane (!%p184_p10), %v265_v4, 3  ;;  %v272_v13 = vrot.slane (!%p184_p10), %v270_v7, 2  ;;  %v899_v17 = vld [vmem:[%s1280_s1 + $0xc] sm:$0xfe] (!%p184_p10)   ;;  %vm222_vm6 = vcmask (!%p184_p10), 516096  }
  0x15   : > { %v275_v14 = vrot.slane (!%p184_p10), %v273_v8, 3  ;;  %v339_v16 = vand.u32 (!%p184_p10), %v898_v12, %v1115_v9  ;;  %v900_v19 = vld [vmem:[%s1280_s1 + $0x10] sm:$0xf8] (!%p184_p10)   ;;  %v390_v23 = vrot.slane (!%p184_p10), %v899_v17, 1  ;;  %v902_v36 = vld [vmem:[%s1280_s1 + $0x18] sm:$0xfc] (!%p184_p10)  }
  0x16   : > { %v268_v15 = vor.u32 (!%p184_p10), %v267_v11, %v264_v10  ;;  %v901_v26 = vld [vmem:[%s1280_s1 + $0x18] ss:$0 sps:$4 sm:$0x33] (!%p184_p10)   ;;  %v454_v27 = vshrl.u32 (!%p184_p10), %v900_v19, 16  ;;  %v457_v32 = vshll.u32 (!%p184_p10), %v900_v19, 16  ;;  %v532_v41 = vrot.slane (!%p184_p10), %v902_v36, 2 }
  0x17   : > { %v276_v18 = vor.u32 (!%p184_p10), %v275_v14, %v272_v13  ;;  %810 = vmatpush3.bf16.msra.mxu1 (!%p184_p10), %v339_v16  ;;  %v462_v33 = vshrl.u32 (!%p184_p10), %v901_v26, 16  ;;  %v465_v34 = vshll.u32 (!%p184_p10), %v901_v26, 16  ;;  %v395_v35 = vand.u32 (!%p184_p10), %v390_v23, %v1115_v9  ;;  %v903_v40 = vld [vmem:[%s1280_s1 + $0x20] ss:$0 sps:$4 sm:$0x11] (!%p184_p10)   ;;  %s788_s13 = sshll.u32 (!%p184_p10), %s1006_s18, 4 }
  0x18   : > { %s213_s9 = scalar_select %p212_p11, %s1006_s18, 1  ;;  %821 = vmatprep.subr.bf16.mxu1 %v1016_v0  ;;  %v456_v31 = vrot.slane %v454_v27, 3  ;;  %v459_v37 = vrot.slane %v457_v32, 4  ;;  %vm452_vm5 = vsmask.f32 4352  ;;  %v533_v45 = vrot.slane %v903_v40, 2 }
  0x19   : > { %v277_v24 = vsel %vm260_vm1, %v268_v15, %v276_v18  ;;  %v464_v38 = vrot.slane %v462_v33, 3  ;;  %v467_v39 = vrot.slane %v465_v34, 4  ;;  %v787_v17 = vld [vmem:[%s1281_s2] ss:$0 sm:$0xff]  ;;  %vm596_vm7 = vcmask 523264   ;;  %s1198_s26 = scalar_lea.hbm %s1282_s3, %s788_s13  ;;  %s1207_s30 = scalar_lea.hbm %s1283_s4, %s788_s13 }
  0x1a   : > { %s792_s10 = sshll.u32 %s213_s9, 4  ;;  %v287_v28 = vand.u32 %v1115_v9, %v277_v24  ;;  %v460_v42 = vor.u32 %v459_v37, %v456_v31  ;;  %v534_v50 = vsel %vm282_vm0, %v532_v41, %v533_v45  ;;  %s1176_s9 = scalar_lea.vmem [#allocation2], %s1173_s8  ;;  %vm598_vm8 = vcmask 519168  }
  0x1b   : > { %s1128_s21 = scalar_lea.vmem %s1279_s0, %s792_s10  ;;  %v468_v43 = vor.u32 %v467_v39, %v464_v38  ;;  %v539_v54 = vand.u32 %v534_v50, %v1115_v9  ;;  %223 = vst.msk [vmem:[%s1176_s9] sm:$0x1] %vm222_vm6, %v1016_v0  ;;  %s1182_s10 = scalar_lea.vmem [#allocation4], %s1173_s8 }
  0x1c   : > { %v766_v20 = vld [vmem:[%s1128_s21 + $0x1] sm:$0xff]  ;;  %v767_v21 = vld [vmem:[%s1128_s21 + $0x9] sm:$0xf]  ;;  %804 = vmatpush3.bf16.msra.mxu0 %v287_v28  ;;  %224 = vst.msk [vmem:[%s1182_s10] sm:$0x1] %vm222_vm6, %v1016_v0  ;;  %s641_s14 = sshll.u32 %s1176_s9, 4  ;;  %s1200_s14 = int_to_ptr.vmem [resolvable:$true] %s641_s14 }
  0x1d   : > { %v227_v22 = vld [vmem:[%s1128_s21] sm:$0xff]  ;;  %v228_v25 = vld [vmem:[%s1128_s21 + $0x8] sm:$0xf]  ;;  %v248_v29 = vpack.c.bf16 %v767_v21, %v766_v20  ;;  %815 = vmatprep.subr.bf16.mxu0 %v1016_v0  ;;  %v469_v49 = vsel %vm452_vm5, %v460_v42, %v468_v43  ;;  %v773_v56 = vld [vmem:[%s1128_s21 + $0xc] sm:$0xf]  ;;  %s625_s5 = scalar_lea.sflag [#allocation3], %s1173_s8 }
  0x1e   : > { %v245_v30 = vpack.c.bf16 %v228_v25, %v227_v22  ;;  %v768_v44 = vld [vmem:[%s1128_s21 + $0x2] sm:$0xff]  ;;  %v769_v46 = vld [vmem:[%s1128_s21 + $0xa] sm:$0xf]  ;;  %v474_v51 = vand.u32 %v469_v49, %v1115_v9  ;;  %s904_s6 = scalar_lea.vmem %s1200_s14, 16  ;;  %s1019_s7 = smov [#allocation2]  }
  0x1f   : > { %806 = vmatmul.mubr.msk.bf16.vlgmr.msra.gmra.mrb[0].mxu0 %vm278_vm4, %v248_v29  ;;  %v770_v47 = vld [vmem:[%s1128_s21 + $0x3] sm:$0xff]  ;;  %v771_v48 = vld [vmem:[%s1128_s21 + $0xb] sm:$0xf]  ;;  %v382_v52 = vpack.c.bf16 %v769_v46, %v768_v44  ;;  %p905_p12 = scmp.ne.s32.totalorder %s1200_s14, %s904_s6  ;;  %s908_s11 = sshll.u32 %s1019_s7, 4  ;;  %s909_s11 = int_to_ptr.vmem [resolvable:$false] %s908_s11 }
  0x20   : > { %812 = vmatmul.mubr.msk.bf16.vlgmr.msra.gmra.mrb[0].mxu1 %vm278_vm4, %v245_v30  ;;  %816 = vmatpush3.bf16.msra.mxu0 %v395_v35  ;;  %v440_v53 = vpack.c.bf16 %v771_v48, %v770_v47  ;;  %v772_v55 = vld [vmem:[%s1128_s21 + $0x4] sm:$0xff]  ;;  %s654_s21 = sshll.u32 %s1182_s10, 4  ;;  %s910_s12 = scalar_lea.vmem %s909_s11, 32  ;;  %s1209_s21 = int_to_ptr.vmem [resolvable:$true] %s654_s21 }
  0x21   : > { %823 = vmatprep.mubr.msk.bf16.mxu1 %vm1018_vm3, %v1016_v0  ;;  %817 = vmatprep.mubr.msk.bf16.mxu0 %vm1018_vm3, %v1016_v0  ;;  %v519_v57 = vpack.c.bf16 %v773_v56, %v772_v55  ;;  %p906_p13 = pnand %p905_p12, %p1086_p4  ;;  %p911_p1 = scmp.lt.s32.totalorder %s1200_s14, %s909_s11 }
  0x22   : > { %827 = vmatprep.subr.bf16.mxu0 %v1016_v0  ;;  %822 = vmatpush3.bf16.msra.mxu1 %v474_v51  ;;  %v595_v44 = vld [vmem:[%s1176_s9] sm:$0x1]  ;;  %p912_p2 = scmp.lt.s32.totalorder %s910_s12, %s904_s6 }
  0x23   : > { %v610_v47 = vld [vmem:[%s1182_s10] sm:$0x1]  ;;  %p907_p0 = pneg %p906_p13 }
  0x24   : > { %p913_p3 = por %p912_p2, %p911_p1 }
  0x26   : > { %p914_p5 = pnand %p913_p3, %p907_p0 }
  0x27   : > { %818 = vmatmul.mubr.msk.bf16.vlgmr.msra.gmra.mrb[4].mxu0 %vm278_vm4, %v382_v52 }
  0x28   : > { %824 = vmatmul.mubr.msk.bf16.vlgmr.msra.gmra.mrb[4].mxu1 %vm278_vm4, %v440_v53  ;;  %828 = vmatpush3.bf16.msra.mxu0 %v539_v54 }
  0x29   : > { %829 = vmatprep.mubr.msk.bf16.mxu0 %vm1018_vm3, %v1016_v0 }
  0x2f   : > { %830 = vmatmul.mubr.msk.bf16.vlgmr.msra.gmra.mrb[8].mxu0 %vm278_vm4, %v519_v57 }
  0xf2   : > { %v323_v61 = vpop.f32.mrb[0].mxu0 }
  0xf3   : > { %v375_v58 = vpop.f32.mrb[0].mxu1  ;;  %v807_v1 = vpop.f32.mrb[1].mxu0 }
  0xf4   : > { %v813_v59 = vpop.f32.mrb[1].mxu1  ;;  %v376_v63 = vadd.f32 %v375_v58, %v323_v61  ;;  %v326_v2 = vpop.f32.mrb[2].mxu0 }
  0xf5   : > { %v378_v60 = vpop.f32.mrb[2].mxu1  ;;  %v808_v4 = vpop.f32.mrb[3].mxu0 }
  0xf6   : > { %v814_v62 = vpop.f32.mrb[3].mxu1  ;;  %v379_v3 = vadd.f32 %v378_v60, %v326_v2 }
  0xfa   : > { %v431_v5 = vpop.f32.mrb[4].mxu0 }
  0xfb   : > { %v510_v6 = vpop.f32.mrb[4].mxu1  ;;  %v438_v7 = vadd.f32 %v431_v5, %v376_v63  ;;  %v819_v8 = vpop.f32.mrb[5].mxu0 }
  0xfc   : > { %v825_v9 = vpop.f32.mrb[5].mxu1  ;;  %v434_v10 = vpop.f32.mrb[6].mxu0 }
  0xfd   : > { %v513_v11 = vpop.f32.mrb[6].mxu1  ;;  %v439_v12 = vadd.f32 %v434_v10, %v379_v3  ;;  %v517_v13 = vadd.f32 %v510_v6, %v438_v7  ;;  %v820_v0 = vpop.f32.mrb[7].mxu0 }
  0xfe   : > { %v826_v14 = vpop.f32.mrb[7].mxu1 }
  0xff   : > { %v518_v15 = vadd.f32 %v513_v11, %v439_v12 }
 0x102   : > { %v575_v16 = vpop.f32.mrb[8].mxu0 }
 0x103   : > { %v582_v18 = vadd.f32 %v575_v16, %v517_v13  ;;  %v831_v19 = vpop.f32.mrb[9].mxu0 }
 0x104   : > { %v578_v20 = vpop.f32.mrb[10].mxu0 }
 0x105   : > { %v591_v21 = vadd.f32 %v787_v17, %v582_v18  ;;  %v583_v22 = vadd.f32 %v578_v20, %v518_v15  ;;  %v832_v23 = vpop.f32.mrb[11].mxu0 }
 0x107   : > { %v593_v24 = vmax.f32 %v591_v21, 0.0  ;;  %v592_v25 = vadd.f32 %v787_v17, %v583_v22 }
 0x109   : > { %v611_v26 = vmul.f32 %v593_v24, %v593_v24  ;;  %v594_v27 = vmax.f32 %v592_v25, 0.0  ;;  %v597_v28 = vsel %vm596_vm7, %v593_v24, 0.0 }
 0x10b   : > { %v599_v29 = vsel %vm598_vm8, %v594_v27, 0.0  ;;  %v612_v30 = vmul.f32 %v594_v27, %v594_v27  ;;  %v613_v32 = vsel %vm596_vm7, %v611_v26, 0.0 }
 0x10c   : > { %v600_v31 = vadd.f32 %v599_v29, %v597_v28 }
 0x10d   : > { %v614_v33 = vsel %vm598_vm8, %v612_v30, 0.0 }
 0x10e   : > { %v601_v34 = vrot.slane %v600_v31, 4  ;;  %v615_v35 = vadd.f32 %v614_v33, %v613_v32 }
 0x110   : > { %v602_v36 = vadd.f32 %v601_v34, %v600_v31  ;;  %v616_v37 = vrot.slane %v615_v35, 4 }
 0x112   : > { %v603_v38 = vrot.slane %v602_v36, 2  ;;  %v617_v39 = vadd.f32 %v616_v37, %v615_v35 }
 0x114   : > { %v604_v40 = vadd.f32 %v603_v38, %v602_v36  ;;  %v618_v41 = vrot.slane %v617_v39, 2 }
 0x116   : > { %v605_v42 = vrot.slane %v604_v40, 1  ;;  %v619_v43 = vadd.f32 %v618_v41, %v617_v39 }
 0x118   : > { %v606_v45 = vadd.f32 %v605_v42, %v604_v40  ;;  %v620_v46 = vrot.slane %v619_v43, 1 }
 0x11a   : > { %v607_v48 = vadd.f32 %v606_v45, %v595_v44  ;;  %v621_v49 = vadd.f32 %v620_v46, %v619_v43 }
 0x11c   : > { %609 = vst.msk [vmem:[%s1176_s9] sm:$0x1] %vm222_vm6, %v607_v48  ;;  %v622_v50 = vadd.f32 %v621_v49, %v610_v47 }
 0x11d   : > { %917 = shalt.err (!%p914_p5)
}
 0x11e   : > { %s918_s9 = scalar_lea.hbm %s1198_s26, 16  ;;  %s922_s24 = scalar_lea.hbm %s1282_s3, 32 }
 0x11f   : > { %p919_p6 = scmp.ne.s32.totalorder %s1198_s26, %s918_s9  ;;  %p923_p10 = scmp.lt.u32.totalorder %s1198_s26, %s1282_s3 }
 0x120   : > { %p924_p11 = scmp.lt.u32.totalorder %s922_s24, %s918_s9  ;;  %p926_p13 = scmp.lt.u32.totalorder %s918_s9, %s1198_s26 }
 0x121   : > { %p920_p7 = pnand %p919_p6, %p1086_p4 }
 0x122   : > { %p925_p12 = por %p924_p11, %p923_p10 }
 0x123   : > { %p921_p9 = pneg %p920_p7 }
 0x124   : > { %p927_p0 = por %p926_p13, %p925_p12 }
 0x126   : > { %p928_p1 = pnand %p927_p0, %p921_p9 }
 0x128   : > { %931 = shalt.err (!%p928_p1)
}
 0x129   : > { %833 = dma.vmem_to_hbm [thread:$0]  (%p1086_p4), %s1200_s14, 16, %s1198_s26, %s625_s5   ;;  %623 = vst.msk [vmem:[%s1182_s10] sm:$0x1] %vm222_vm6, %v622_v50 }
 0x12a   : > { %s629_s6 = scalar_lea.sflag [#allocation5], %s1173_s8  ;;  %s932_s7 = scalar_lea.vmem %s1209_s21, 16 }
 0x12b   : > { %p933_p2 = scmp.ne.s32.totalorder %s1209_s21, %s932_s7  ;;  %s1020_s11 = smov [#allocation4]  }
 0x12c   : > { %s936_s12 = sshll.u32 %s1020_s11, 4  ;;  %s937_s12 = int_to_ptr.vmem [resolvable:$false] %s936_s12 }
 0x12d   : > { %p934_p3 = pnand %p933_p2, %p1086_p4  ;;  %s938_s9 = scalar_lea.vmem %s937_s12, 32 }
 0x12e   : > { %p939_p6 = scmp.lt.s32.totalorder %s1209_s21, %s937_s12  ;;  %p940_p7 = scmp.lt.s32.totalorder %s938_s9, %s932_s7 }
 0x12f   : > { %p935_p5 = pneg %p934_p3 }
 0x130   : > { %p941_p9 = por %p940_p7, %p939_p6 }
 0x132   : > { %p942_p10 = pnand %p941_p9, %p935_p5 }
 0x134   : > { %945 = shalt.err (!%p942_p10)
}
 0x135   : > { %s946_s8 = scalar_lea.hbm %s1207_s30, 16  ;;  %s950_s26 = scalar_lea.hbm %s1283_s4, 32 }
 0x136   : > { %p947_p11 = scmp.ne.s32.totalorder %s1207_s30, %s946_s8  ;;  %p951_p0 = scmp.lt.u32.totalorder %s1207_s30, %s1283_s4 }
 0x137   : > { %p952_p1 = scmp.lt.u32.totalorder %s950_s26, %s946_s8  ;;  %p954_p3 = scmp.lt.u32.totalorder %s946_s8, %s1207_s30 }
 0x138   : > { %p948_p12 = pnand %p947_p11, %p1086_p4 }
 0x139   : > { %p953_p2 = por %p952_p1, %p951_p0 }
 0x13a   : > { %p949_p13 = pneg %p948_p12 }
 0x13b   : > { %p955_p5 = por %p954_p3, %p953_p2 }
 0x13d   : > { %p956_p6 = pnand %p955_p5, %p949_p13 }
 0x13f   : > { %959 = shalt.err (!%p956_p6)
}
 0x140   : > { %834 = dma.vmem_to_hbm [thread:$0]  (%p1086_p4), %s1209_s21, 16, %s1207_s30, %s629_s6  }
 0x141 PF: > { %p844_p7 = scmp.ge.s32.totalorder %s1014_s20, 2  ;;  %s666_s22 = sand.u32 1, %s994_s15  }
 0x142   : > { %s667_s24 = scalar_lea.sflag [#allocation3], %s666_s22 }
 0x143   : > { %p838_p9 = pnand %p844_p7, %p1093_p8 }
 0x145   : > { %985 = dma.done.wait (!%p838_p9), %s667_s24, 16  }
 0x146   : > { %987 = vsyncadd (!%p838_p9), %s667_s24, 4294967280  ;;  %s675_s18 = scalar_lea.sflag [#allocation5], %s666_s22 }
 0x147   : > { %989 = dma.done.wait (!%p838_p9), %s675_s18, 16  }
 0x148   : > { %991 = vsyncadd (!%p838_p9), %s675_s18, 4294967280  ;;  %s21_s20 = sadd.s32 1, %s1014_s20   ;;  %s1286_s15 = smov %s998_s16 }
 0x149   : > { %p18_p10 = scmp.ge.s32.totalorder %s21_s20, 4   ;;  %s1287_s16 = smov %s1002_s17 }
 0x14a   : > { %s1288_s17 = smov %s1099_s28  ;;  %s1289_s18 = smov %s1010_s19 }
 0x14b   : > { %s1290_s19 = smov %s1292_s23  ;;  %20 = sbr.rel (!%p18_p10) target bundleno = 6 (0x6), region = 93 }
 0x152   :  { %679 = vsyncpa [#allocation3], 1 }
 0x153   :  { %681 = vsyncpa [#allocation3 + $0x1], 1 }
 0x154   :  { %682 = vsyncpa [#allocation5], 1 }
 0x155   :  { %684 = vsyncpa [#allocation5 + $0x1], 1 }

</bundles_post_ra>
